<compile_context>
chip_gen: v6e
topology: v6e:2x2x1
jax: 0.10.0
libtpu: 0.0.40
codegen_flags: <defaults>
</compile_context>

<pallas_src>
import jax
import jax.numpy as jnp
from jax.experimental import pallas as pl
from jax.experimental.pallas import tpu as pltpu

SEQ_LEN = 8
BATCH = 2
INPUT_SIZE = 16
HIDDEN_SIZE = 32
OUTPUT_SIZE = 4  # self.out = nn.Linear(H, O): defined but unused in forward()


def lstm_kernel(x_ref, wih_ref, whh_ref, b_ref, h0_ref, c0_ref, out_ref, cn_ref):
    """Whole LSTM recurrence in a single gridless invocation.

    x_ref:   (T*B, I)   all timesteps, flattened for one input-projection matmul
    wih_ref: (I, 4H)    W_ih^T  (pre-transposed at init)
    whh_ref: (H, 4H)    W_hh^T  (pre-transposed at init)
    b_ref:   (1, 4H)    b_ih + b_hh (pre-fused at init)
    h0_ref:  (1, B, H)  initial hidden state
    c0_ref:  (1, B, H)  initial cell state
    out_ref: (T*B, H)   hidden outputs (2D, lane/tile friendly), written per step
    cn_ref:  (B, H)     final cell state, written once at the end
    """
    TB, H = out_ref.shape
    B = cn_ref.shape[0]
    T = TB // B

    # ---- Prologue (off the serial chain) -------------------------------------------------
    # Input projection for ALL timesteps in one well-shaped MXU pass + fused bias:
    # (T*B, I) @ (I, 4H) + (1, 4H) -> (T*B, 4H)
    xg = (jnp.dot(x_ref[...], wih_ref[...], preferred_element_type=jnp.float32)
          + b_ref[...])
    # Hoist the per-timestep row slices: they depend only on xg, so the sublane extracts
    # happen here (idle XLU), never on the h -> h critical path.
    xg_t = [xg[t * B:(t + 1) * B, :] for t in range(T)]

    whh = whh_ref[...]
    h = h0_ref[0].astype(jnp.float32)   # (B, H)
    c = c0_ref[0].astype(jnp.float32)   # (B, H)

    # ---- Serial recurrence (fully unrolled; T is static and small) ------------------------
    for t in range(T):
        # Only the recurrent matmul + gate math sit on the serial critical path.
        gates = xg_t[t] + jnp.dot(h, whh, preferred_element_type=jnp.float32)  # (B, 4H)

        # 3 EUP pushes per step instead of 5: activate the full 128-lane gate vreg once
        # with sigmoid and once with tanh, then lane-extract the pieces (XLU slot is idle).
        # PyTorch gate ordering in the fused 4H axis: input, forget, cell(g), output.
        sg = jax.nn.sigmoid(gates)
        tg = jnp.tanh(gates)
        i_g = sg[:, 0 * H:1 * H]
        f_g = sg[:, 1 * H:2 * H]
        o_g = sg[:, 3 * H:4 * H]
        g_g = tg[:, 2 * H:3 * H]

        c = f_g * c + i_g * g_g
        h = o_g * jnp.tanh(c)           # third (and last) EUP push of the step

        # Per-step store rides the otherwise-idle vst slot and overlaps the next matmul.
        out_ref[pl.ds(t * B, B), :] = h.astype(out_ref.dtype)

    cn_ref[...] = c.astype(cn_ref.dtype)


def prepare_kernel_params(params):
    """One-time (init-time) layout prep.

    Runs eagerly, outside the per-call path, so no transpose/bias-add XLA ops are
    dispatched alongside the (~µs-scale) kernel at forward time.
    """
    return {
        "wih_t": jnp.transpose(params["w_ih"]),                        # (I, 4H)
        "whh_t": jnp.transpose(params["w_hh"]),                        # (H, 4H)
        "bias": (params["b_ih"] + params["b_hh"]).reshape(1, -1),      # (1, 4H)
    }


@jax.jit
def lstm_forward(x, h_state, kparams):
    """Mirrors LSTM.forward(x, h_state) -> (out, (h_n, c_n))."""
    T, B, I = x.shape
    H = HIDDEN_SIZE
    h0, c0 = h_state                     # each (1, B, H); squeezed inside the kernel

    x2d = x.reshape(T * B, I)            # contiguous row-major reshape (free)

    vmem = pl.BlockSpec(memory_space=pltpu.MemorySpace.VMEM)
    out2d, c_n = pl.pallas_call(
        lstm_kernel,
        out_shape=(
            jax.ShapeDtypeStruct((T * B, H), x.dtype),
            jax.ShapeDtypeStruct((B, H), x.dtype),
        ),
        in_specs=[vmem] * 6,
        out_specs=(vmem, vmem),
        # Tiny kernel: tell XLA so surrounding ops (reshape, h_n slice) schedule tightly.
        cost_estimate=pl.CostEstimate(
            flops=210_000, transcendentals=4_608, bytes_accessed=28_928),
        # No grid: whole problem in one invocation; resident footprint < 100 KiB, fits
        # VMEM with huge margin on v5e/v6e and v7x (64 MiB).
    )(x2d, kparams["wih_t"], kparams["whh_t"], kparams["bias"], h0, c0)

    out = out2d.reshape(T, B, H)         # free row-major reshape back
    h_n = out[-1]                        # exact: out dtype == compute dtype (f32)
    return out, (h_n[None], c_n[None])   # (1, B, H) like PyTorch


def lstm_reference(x, h_state, params):
    """Pure-JAX reference (PyTorch nn.LSTM semantics, num_layers=1)."""
    w_ih, w_hh, b_ih, b_hh = (params["w_ih"], params["w_hh"],
                              params["b_ih"], params["b_hh"])
    h = h_state[0][0].astype(jnp.float32)
    c = h_state[1][0].astype(jnp.float32)
    H = HIDDEN_SIZE
    outs = []
    for t in range(x.shape[0]):
        gates = (x[t].astype(jnp.float32) @ w_ih.T
                 + h @ w_hh.T + b_ih + b_hh)
        i_g = jax.nn.sigmoid(gates[:, 0 * H:1 * H])
        f_g = jax.nn.sigmoid(gates[:, 1 * H:2 * H])
        g_g = jnp.tanh(gates[:, 2 * H:3 * H])
        o_g = jax.nn.sigmoid(gates[:, 3 * H:4 * H])
        c = f_g * c + i_g * g_g
        h = o_g * jnp.tanh(c)
        outs.append(h)
    out = jnp.stack(outs, axis=0).astype(x.dtype)
    return out, (h[None].astype(x.dtype), c[None].astype(x.dtype))


def init_params(key):
    """Deterministic init matching PyTorch's U(-1/sqrt(H), 1/sqrt(H))."""
    H, I, O = HIDDEN_SIZE, INPUT_SIZE, OUTPUT_SIZE
    k = 1.0 / jnp.sqrt(jnp.float32(H))
    keys = jax.random.split(key, 6)
    params = {
        "w_ih": jax.random.uniform(keys[0], (4 * H, I), jnp.float32, -k, k),
        "w_hh": jax.random.uniform(keys[1], (4 * H, H), jnp.float32, -k, k),
        "b_ih": jax.random.uniform(keys[2], (4 * H,), jnp.float32, -k, k),
        "b_hh": jax.random.uniform(keys[3], (4 * H,), jnp.float32, -k, k),
        # self.out = nn.Linear(HIDDEN_SIZE, OUTPUT_SIZE): unused in forward()
        "out_w": jax.random.uniform(keys[4], (O, H), jnp.float32, -k, k),
        "out_b": jax.random.uniform(keys[5], (O,), jnp.float32, -k, k),
    }
    return params


if __name__ == "__main__":
    key = jax.random.PRNGKey(0)
    kp, kx, kh, kc = jax.random.split(key, 4)

    params = init_params(kp)
    kparams = prepare_kernel_params(params)   # hoisted, one-time layout prep

    x = jax.random.normal(kx, (SEQ_LEN, BATCH, INPUT_SIZE), jnp.float32)
    h0 = jax.random.normal(kh, (1, BATCH, HIDDEN_SIZE), jnp.float32)
    c0 = jax.random.normal(kc, (1, BATCH, HIDDEN_SIZE), jnp.float32)
    h_state = (h0, c0)

    out, (h_n, c_n) = lstm_forward(x, h_state, kparams)
    jax.block_until_ready((out, h_n, c_n))

    ref_out, (ref_h, ref_c) = lstm_reference(x, h_state, params)
    assert out.shape == (SEQ_LEN, BATCH, HIDDEN_SIZE)
    assert h_n.shape == (1, BATCH, HIDDEN_SIZE)
    assert c_n.shape == (1, BATCH, HIDDEN_SIZE)
    assert jnp.allclose(out, ref_out, atol=1e-5, rtol=1e-5)
    assert jnp.allclose(h_n, ref_h, atol=1e-5, rtol=1e-5)
    assert jnp.allclose(c_n, ref_c, atol=1e-5, rtol=1e-5)

    print("KERNEL_OK")
</pallas_src>

<mosaic_0001>
module attributes {stable_mosaic.version = 11 : i64} {
  func.func @lstm_kernel(%arg0: memref<16x16xf32, #tpu.memory_space<vmem>>, %arg1: memref<16x128xf32, #tpu.memory_space<vmem>>, %arg2: memref<32x128xf32, #tpu.memory_space<vmem>>, %arg3: memref<1x128xf32, #tpu.memory_space<vmem>>, %arg4: memref<1x2x32xf32, #tpu.memory_space<vmem>>, %arg5: memref<1x2x32xf32, #tpu.memory_space<vmem>>, %arg6: memref<16x32xf32, #tpu.memory_space<vmem>>, %arg7: memref<2x32xf32, #tpu.memory_space<vmem>>) attributes {dimension_semantics = [], scalar_prefetch = 0 : i64, scratch_operands = 0 : i64, tpu.core_type = #tpu.core_type<tc>} {
    %c0 = arith.constant 0 : index
    %c0_0 = arith.constant 0 : index
    %0 = vector.load %arg0[%c0, %c0_0] : memref<16x16xf32, #tpu.memory_space<vmem>>, vector<16x16xf32>
    %c0_1 = arith.constant 0 : index
    %c0_2 = arith.constant 0 : index
    %1 = vector.load %arg1[%c0_1, %c0_2] : memref<16x128xf32, #tpu.memory_space<vmem>>, vector<16x128xf32>
    %cst = arith.constant dense<0.000000e+00> : vector<16x128xf32>
    %2 = tpu.matmul %0, %1, %cst {dimension_numbers = #tpu.dot_dimension_numbers<[1], [0], [0], [1], [0, 0, 1, 1], [], []>} : vector<16x16xf32>, vector<16x128xf32>, vector<16x128xf32> -> vector<16x128xf32>
    %c0_3 = arith.constant 0 : index
    %c0_4 = arith.constant 0 : index
    %3 = vector.load %arg3[%c0_3, %c0_4] : memref<1x128xf32, #tpu.memory_space<vmem>>, vector<1x128xf32>
    %4 = vector.broadcast %3 : vector<1x128xf32> to vector<16x128xf32>
    %5 = arith.addf %2, %4 : vector<16x128xf32>
    %6 = vector.extract_strided_slice %5 {offsets = [0, 0], sizes = [2, 128], strides = [1, 1]} : vector<16x128xf32> to vector<2x128xf32>
    %7 = vector.extract_strided_slice %5 {offsets = [2, 0], sizes = [2, 128], strides = [1, 1]} : vector<16x128xf32> to vector<2x128xf32>
    %8 = vector.extract_strided_slice %5 {offsets = [4, 0], sizes = [2, 128], strides = [1, 1]} : vector<16x128xf32> to vector<2x128xf32>
    %9 = vector.extract_strided_slice %5 {offsets = [6, 0], sizes = [2, 128], strides = [1, 1]} : vector<16x128xf32> to vector<2x128xf32>
    %10 = vector.extract_strided_slice %5 {offsets = [8, 0], sizes = [2, 128], strides = [1, 1]} : vector<16x128xf32> to vector<2x128xf32>
    %11 = vector.extract_strided_slice %5 {offsets = [10, 0], sizes = [2, 128], strides = [1, 1]} : vector<16x128xf32> to vector<2x128xf32>
    %12 = vector.extract_strided_slice %5 {offsets = [12, 0], sizes = [2, 128], strides = [1, 1]} : vector<16x128xf32> to vector<2x128xf32>
    %13 = vector.extract_strided_slice %5 {offsets = [14, 0], sizes = [2, 128], strides = [1, 1]} : vector<16x128xf32> to vector<2x128xf32>
    %c0_5 = arith.constant 0 : index
    %c0_6 = arith.constant 0 : index
    %14 = vector.load %arg2[%c0_5, %c0_6] : memref<32x128xf32, #tpu.memory_space<vmem>>, vector<32x128xf32>
    %c0_7 = arith.constant 0 : index
    %c0_8 = arith.constant 0 : index
    %c0_9 = arith.constant 0 : index
    %15 = vector.load %arg4[%c0_7, %c0_8, %c0_9] : memref<1x2x32xf32, #tpu.memory_space<vmem>>, vector<1x2x32xf32>
    %16 = vector.shape_cast %15 : vector<1x2x32xf32> to vector<2x32xf32>
    %c0_10 = arith.constant 0 : index
    %c0_11 = arith.constant 0 : index
    %c0_12 = arith.constant 0 : index
    %17 = vector.load %arg5[%c0_10, %c0_11, %c0_12] : memref<1x2x32xf32, #tpu.memory_space<vmem>>, vector<1x2x32xf32>
    %18 = vector.shape_cast %17 : vector<1x2x32xf32> to vector<2x32xf32>
    %cst_13 = arith.constant dense<0.000000e+00> : vector<2x128xf32>
    %19 = tpu.matmul %16, %14, %cst_13 {dimension_numbers = #tpu.dot_dimension_numbers<[1], [0], [0], [1], [0, 0, 1, 1], [], []>} : vector<2x32xf32>, vector<32x128xf32>, vector<2x128xf32> -> vector<2x128xf32>
    %20 = arith.addf %6, %19 : vector<2x128xf32>
    %21 = arith.negf %20 : vector<2x128xf32>
    %22 = math.exp %21 : vector<2x128xf32>
    %cst_14 = arith.constant 1.000000e+00 : f32
    %23 = vector.broadcast %cst_14 : f32 to vector<2x128xf32>
    %24 = arith.addf %23, %22 : vector<2x128xf32>
    %25 = arith.divf %23, %24 : vector<2x128xf32>
    %26 = math.tanh %20 : vector<2x128xf32>
    %27 = vector.extract_strided_slice %25 {offsets = [0, 0], sizes = [2, 32], strides = [1, 1]} : vector<2x128xf32> to vector<2x32xf32>
    %28 = vector.extract_strided_slice %25 {offsets = [0, 32], sizes = [2, 32], strides = [1, 1]} : vector<2x128xf32> to vector<2x32xf32>
    %29 = vector.extract_strided_slice %25 {offsets = [0, 96], sizes = [2, 32], strides = [1, 1]} : vector<2x128xf32> to vector<2x32xf32>
    %30 = vector.extract_strided_slice %26 {offsets = [0, 64], sizes = [2, 32], strides = [1, 1]} : vector<2x128xf32> to vector<2x32xf32>
    %31 = arith.mulf %28, %18 : vector<2x32xf32>
    %32 = arith.mulf %27, %30 : vector<2x32xf32>
    %33 = arith.addf %31, %32 : vector<2x32xf32>
    %34 = math.tanh %33 : vector<2x32xf32>
    %35 = arith.mulf %29, %34 : vector<2x32xf32>
    %c0_15 = arith.constant 0 : index
    %c0_16 = arith.constant 0 : index
    %36 = vector.load %arg6[%c0_15, %c0_16] : memref<16x32xf32, #tpu.memory_space<vmem>>, vector<2x32xf32>
    tpu.vector_store %arg6[%c0_15, %c0_16], %35 {strides = array<i32>} : memref<16x32xf32, #tpu.memory_space<vmem>>, vector<2x32xf32>,
    %cst_17 = arith.constant dense<0.000000e+00> : vector<2x128xf32>
    %37 = tpu.matmul %35, %14, %cst_17 {dimension_numbers = #tpu.dot_dimension_numbers<[1], [0], [0], [1], [0, 0, 1, 1], [], []>} : vector<2x32xf32>, vector<32x128xf32>, vector<2x128xf32> -> vector<2x128xf32>
    %38 = arith.addf %7, %37 : vector<2x128xf32>
    %39 = arith.negf %38 : vector<2x128xf32>
    %40 = math.exp %39 : vector<2x128xf32>
    %cst_18 = arith.constant 1.000000e+00 : f32
    %41 = vector.broadcast %cst_18 : f32 to vector<2x128xf32>
    %42 = arith.addf %41, %40 : vector<2x128xf32>
    %43 = arith.divf %41, %42 : vector<2x128xf32>
    %44 = math.tanh %38 : vector<2x128xf32>
    %45 = vector.extract_strided_slice %43 {offsets = [0, 0], sizes = [2, 32], strides = [1, 1]} : vector<2x128xf32> to vector<2x32xf32>
    %46 = vector.extract_strided_slice %43 {offsets = [0, 32], sizes = [2, 32], strides = [1, 1]} : vector<2x128xf32> to vector<2x32xf32>
    %47 = vector.extract_strided_slice %43 {offsets = [0, 96], sizes = [2, 32], strides = [1, 1]} : vector<2x128xf32> to vector<2x32xf32>
    %48 = vector.extract_strided_slice %44 {offsets = [0, 64], sizes = [2, 32], strides = [1, 1]} : vector<2x128xf32> to vector<2x32xf32>
    %49 = arith.mulf %46, %33 : vector<2x32xf32>
    %50 = arith.mulf %45, %48 : vector<2x32xf32>
    %51 = arith.addf %49, %50 : vector<2x32xf32>
    %52 = math.tanh %51 : vector<2x32xf32>
    %53 = arith.mulf %47, %52 : vector<2x32xf32>
    %c2 = arith.constant 2 : index
    %c0_19 = arith.constant 0 : index
    %54 = vector.load %arg6[%c2, %c0_19] : memref<16x32xf32, #tpu.memory_space<vmem>>, vector<2x32xf32>
    tpu.vector_store %arg6[%c2, %c0_19], %53 {strides = array<i32>} : memref<16x32xf32, #tpu.memory_space<vmem>>, vector<2x32xf32>,
    %cst_20 = arith.constant dense<0.000000e+00> : vector<2x128xf32>
    %55 = tpu.matmul %53, %14, %cst_20 {dimension_numbers = #tpu.dot_dimension_numbers<[1], [0], [0], [1], [0, 0, 1, 1], [], []>} : vector<2x32xf32>, vector<32x128xf32>, vector<2x128xf32> -> vector<2x128xf32>
    %56 = arith.addf %8, %55 : vector<2x128xf32>
    %57 = arith.negf %56 : vector<2x128xf32>
    %58 = math.exp %57 : vector<2x128xf32>
    %cst_21 = arith.constant 1.000000e+00 : f32
    %59 = vector.broadcast %cst_21 : f32 to vector<2x128xf32>
    %60 = arith.addf %59, %58 : vector<2x128xf32>
    %61 = arith.divf %59, %60 : vector<2x128xf32>
    %62 = math.tanh %56 : vector<2x128xf32>
    %63 = vector.extract_strided_slice %61 {offsets = [0, 0], sizes = [2, 32], strides = [1, 1]} : vector<2x128xf32> to vector<2x32xf32>
    %64 = vector.extract_strided_slice %61 {offsets = [0, 32], sizes = [2, 32], strides = [1, 1]} : vector<2x128xf32> to vector<2x32xf32>
    %65 = vector.extract_strided_slice %61 {offsets = [0, 96], sizes = [2, 32], strides = [1, 1]} : vector<2x128xf32> to vector<2x32xf32>
    %66 = vector.extract_strided_slice %62 {offsets = [0, 64], sizes = [2, 32], strides = [1, 1]} : vector<2x128xf32> to vector<2x32xf32>
    %67 = arith.mulf %64, %51 : vector<2x32xf32>
    %68 = arith.mulf %63, %66 : vector<2x32xf32>
    %69 = arith.addf %67, %68 : vector<2x32xf32>
    %70 = math.tanh %69 : vector<2x32xf32>
    %71 = arith.mulf %65, %70 : vector<2x32xf32>
    %c4 = arith.constant 4 : index
    %c0_22 = arith.constant 0 : index
    %72 = vector.load %arg6[%c4, %c0_22] : memref<16x32xf32, #tpu.memory_space<vmem>>, vector<2x32xf32>
    tpu.vector_store %arg6[%c4, %c0_22], %71 {strides = array<i32>} : memref<16x32xf32, #tpu.memory_space<vmem>>, vector<2x32xf32>,
    %cst_23 = arith.constant dense<0.000000e+00> : vector<2x128xf32>
    %73 = tpu.matmul %71, %14, %cst_23 {dimension_numbers = #tpu.dot_dimension_numbers<[1], [0], [0], [1], [0, 0, 1, 1], [], []>} : vector<2x32xf32>, vector<32x128xf32>, vector<2x128xf32> -> vector<2x128xf32>
    %74 = arith.addf %9, %73 : vector<2x128xf32>
    %75 = arith.negf %74 : vector<2x128xf32>
    %76 = math.exp %75 : vector<2x128xf32>
    %cst_24 = arith.constant 1.000000e+00 : f32
    %77 = vector.broadcast %cst_24 : f32 to vector<2x128xf32>
    %78 = arith.addf %77, %76 : vector<2x128xf32>
    %79 = arith.divf %77, %78 : vector<2x128xf32>
    %80 = math.tanh %74 : vector<2x128xf32>
    %81 = vector.extract_strided_slice %79 {offsets = [0, 0], sizes = [2, 32], strides = [1, 1]} : vector<2x128xf32> to vector<2x32xf32>
    %82 = vector.extract_strided_slice %79 {offsets = [0, 32], sizes = [2, 32], strides = [1, 1]} : vector<2x128xf32> to vector<2x32xf32>
    %83 = vector.extract_strided_slice %79 {offsets = [0, 96], sizes = [2, 32], strides = [1, 1]} : vector<2x128xf32> to vector<2x32xf32>
    %84 = vector.extract_strided_slice %80 {offsets = [0, 64], sizes = [2, 32], strides = [1, 1]} : vector<2x128xf32> to vector<2x32xf32>
    %85 = arith.mulf %82, %69 : vector<2x32xf32>
    %86 = arith.mulf %81, %84 : vector<2x32xf32>
    %87 = arith.addf %85, %86 : vector<2x32xf32>
    %88 = math.tanh %87 : vector<2x32xf32>
    %89 = arith.mulf %83, %88 : vector<2x32xf32>
    %c6 = arith.constant 6 : index
    %c0_25 = arith.constant 0 : index
    %90 = vector.load %arg6[%c6, %c0_25] : memref<16x32xf32, #tpu.memory_space<vmem>>, vector<2x32xf32>
    tpu.vector_store %arg6[%c6, %c0_25], %89 {strides = array<i32>} : memref<16x32xf32, #tpu.memory_space<vmem>>, vector<2x32xf32>,
    %cst_26 = arith.constant dense<0.000000e+00> : vector<2x128xf32>
    %91 = tpu.matmul %89, %14, %cst_26 {dimension_numbers = #tpu.dot_dimension_numbers<[1], [0], [0], [1], [0, 0, 1, 1], [], []>} : vector<2x32xf32>, vector<32x128xf32>, vector<2x128xf32> -> vector<2x128xf32>
    %92 = arith.addf %10, %91 : vector<2x128xf32>
    %93 = arith.negf %92 : vector<2x128xf32>
    %94 = math.exp %93 : vector<2x128xf32>
    %cst_27 = arith.constant 1.000000e+00 : f32
    %95 = vector.broadcast %cst_27 : f32 to vector<2x128xf32>
    %96 = arith.addf %95, %94 : vector<2x128xf32>
    %97 = arith.divf %95, %96 : vector<2x128xf32>
    %98 = math.tanh %92 : vector<2x128xf32>
    %99 = vector.extract_strided_slice %97 {offsets = [0, 0], sizes = [2, 32], strides = [1, 1]} : vector<2x128xf32> to vector<2x32xf32>
    %100 = vector.extract_strided_slice %97 {offsets = [0, 32], sizes = [2, 32], strides = [1, 1]} : vector<2x128xf32> to vector<2x32xf32>
    %101 = vector.extract_strided_slice %97 {offsets = [0, 96], sizes = [2, 32], strides = [1, 1]} : vector<2x128xf32> to vector<2x32xf32>
    %102 = vector.extract_strided_slice %98 {offsets = [0, 64], sizes = [2, 32], strides = [1, 1]} : vector<2x128xf32> to vector<2x32xf32>
    %103 = arith.mulf %100, %87 : vector<2x32xf32>
    %104 = arith.mulf %99, %102 : vector<2x32xf32>
    %105 = arith.addf %103, %104 : vector<2x32xf32>
    %106 = math.tanh %105 : vector<2x32xf32>
    %107 = arith.mulf %101, %106 : vector<2x32xf32>
    %c8 = arith.constant 8 : index
    %c0_28 = arith.constant 0 : index
    %108 = vector.load %arg6[%c8, %c0_28] : memref<16x32xf32, #tpu.memory_space<vmem>>, vector<2x32xf32>
    tpu.vector_store %arg6[%c8, %c0_28], %107 {strides = array<i32>} : memref<16x32xf32, #tpu.memory_space<vmem>>, vector<2x32xf32>,
    %cst_29 = arith.constant dense<0.000000e+00> : vector<2x128xf32>
    %109 = tpu.matmul %107, %14, %cst_29 {dimension_numbers = #tpu.dot_dimension_numbers<[1], [0], [0], [1], [0, 0, 1, 1], [], []>} : vector<2x32xf32>, vector<32x128xf32>, vector<2x128xf32> -> vector<2x128xf32>
    %110 = arith.addf %11, %109 : vector<2x128xf32>
    %111 = arith.negf %110 : vector<2x128xf32>
    %112 = math.exp %111 : vector<2x128xf32>
    %cst_30 = arith.constant 1.000000e+00 : f32
    %113 = vector.broadcast %cst_30 : f32 to vector<2x128xf32>
    %114 = arith.addf %113, %112 : vector<2x128xf32>
    %115 = arith.divf %113, %114 : vector<2x128xf32>
    %116 = math.tanh %110 : vector<2x128xf32>
    %117 = vector.extract_strided_slice %115 {offsets = [0, 0], sizes = [2, 32], strides = [1, 1]} : vector<2x128xf32> to vector<2x32xf32>
    %118 = vector.extract_strided_slice %115 {offsets = [0, 32], sizes = [2, 32], strides = [1, 1]} : vector<2x128xf32> to vector<2x32xf32>
    %119 = vector.extract_strided_slice %115 {offsets = [0, 96], sizes = [2, 32], strides = [1, 1]} : vector<2x128xf32> to vector<2x32xf32>
    %120 = vector.extract_strided_slice %116 {offsets = [0, 64], sizes = [2, 32], strides = [1, 1]} : vector<2x128xf32> to vector<2x32xf32>
    %121 = arith.mulf %118, %105 : vector<2x32xf32>
    %122 = arith.mulf %117, %120 : vector<2x32xf32>
    %123 = arith.addf %121, %122 : vector<2x32xf32>
    %124 = math.tanh %123 : vector<2x32xf32>
    %125 = arith.mulf %119, %124 : vector<2x32xf32>
    %c10 = arith.constant 10 : index
    %c0_31 = arith.constant 0 : index
    %126 = vector.load %arg6[%c10, %c0_31] : memref<16x32xf32, #tpu.memory_space<vmem>>, vector<2x32xf32>
    tpu.vector_store %arg6[%c10, %c0_31], %125 {strides = array<i32>} : memref<16x32xf32, #tpu.memory_space<vmem>>, vector<2x32xf32>,
    %cst_32 = arith.constant dense<0.000000e+00> : vector<2x128xf32>
    %127 = tpu.matmul %125, %14, %cst_32 {dimension_numbers = #tpu.dot_dimension_numbers<[1], [0], [0], [1], [0, 0, 1, 1], [], []>} : vector<2x32xf32>, vector<32x128xf32>, vector<2x128xf32> -> vector<2x128xf32>
    %128 = arith.addf %12, %127 : vector<2x128xf32>
    %129 = arith.negf %128 : vector<2x128xf32>
    %130 = math.exp %129 : vector<2x128xf32>
    %cst_33 = arith.constant 1.000000e+00 : f32
    %131 = vector.broadcast %cst_33 : f32 to vector<2x128xf32>
    %132 = arith.addf %131, %130 : vector<2x128xf32>
    %133 = arith.divf %131, %132 : vector<2x128xf32>
    %134 = math.tanh %128 : vector<2x128xf32>
    %135 = vector.extract_strided_slice %133 {offsets = [0, 0], sizes = [2, 32], strides = [1, 1]} : vector<2x128xf32> to vector<2x32xf32>
    %136 = vector.extract_strided_slice %133 {offsets = [0, 32], sizes = [2, 32], strides = [1, 1]} : vector<2x128xf32> to vector<2x32xf32>
    %137 = vector.extract_strided_slice %133 {offsets = [0, 96], sizes = [2, 32], strides = [1, 1]} : vector<2x128xf32> to vector<2x32xf32>
    %138 = vector.extract_strided_slice %134 {offsets = [0, 64], sizes = [2, 32], strides = [1, 1]} : vector<2x128xf32> to vector<2x32xf32>
    %139 = arith.mulf %136, %123 : vector<2x32xf32>
    %140 = arith.mulf %135, %138 : vector<2x32xf32>
    %141 = arith.addf %139, %140 : vector<2x32xf32>
    %142 = math.tanh %141 : vector<2x32xf32>
    %143 = arith.mulf %137, %142 : vector<2x32xf32>
    %c12 = arith.constant 12 : index
    %c0_34 = arith.constant 0 : index
    %144 = vector.load %arg6[%c12, %c0_34] : memref<16x32xf32, #tpu.memory_space<vmem>>, vector<2x32xf32>
    tpu.vector_store %arg6[%c12, %c0_34], %143 {strides = array<i32>} : memref<16x32xf32, #tpu.memory_space<vmem>>, vector<2x32xf32>,
    %cst_35 = arith.constant dense<0.000000e+00> : vector<2x128xf32>
    %145 = tpu.matmul %143, %14, %cst_35 {dimension_numbers = #tpu.dot_dimension_numbers<[1], [0], [0], [1], [0, 0, 1, 1], [], []>} : vector<2x32xf32>, vector<32x128xf32>, vector<2x128xf32> -> vector<2x128xf32>
    %146 = arith.addf %13, %145 : vector<2x128xf32>
    %147 = arith.negf %146 : vector<2x128xf32>
    %148 = math.exp %147 : vector<2x128xf32>
    %cst_36 = arith.constant 1.000000e+00 : f32
    %149 = vector.broadcast %cst_36 : f32 to vector<2x128xf32>
    %150 = arith.addf %149, %148 : vector<2x128xf32>
    %151 = arith.divf %149, %150 : vector<2x128xf32>
    %152 = math.tanh %146 : vector<2x128xf32>
    %153 = vector.extract_strided_slice %151 {offsets = [0, 0], sizes = [2, 32], strides = [1, 1]} : vector<2x128xf32> to vector<2x32xf32>
    %154 = vector.extract_strided_slice %151 {offsets = [0, 32], sizes = [2, 32], strides = [1, 1]} : vector<2x128xf32> to vector<2x32xf32>
    %155 = vector.extract_strided_slice %151 {offsets = [0, 96], sizes = [2, 32], strides = [1, 1]} : vector<2x128xf32> to vector<2x32xf32>
    %156 = vector.extract_strided_slice %152 {offsets = [0, 64], sizes = [2, 32], strides = [1, 1]} : vector<2x128xf32> to vector<2x32xf32>
    %157 = arith.mulf %154, %141 : vector<2x32xf32>
    %158 = arith.mulf %153, %156 : vector<2x32xf32>
    %159 = arith.addf %157, %158 : vector<2x32xf32>
    %160 = math.tanh %159 : vector<2x32xf32>
    %161 = arith.mulf %155, %160 : vector<2x32xf32>
    %c14 = arith.constant 14 : index
    %c0_37 = arith.constant 0 : index
    %162 = vector.load %arg6[%c14, %c0_37] : memref<16x32xf32, #tpu.memory_space<vmem>>, vector<2x32xf32>
    tpu.vector_store %arg6[%c14, %c0_37], %161 {strides = array<i32>} : memref<16x32xf32, #tpu.memory_space<vmem>>, vector<2x32xf32>,
    %c0_38 = arith.constant 0 : index
    %c0_39 = arith.constant 0 : index
    %163 = vector.load %arg7[%c0_38, %c0_39] : memref<2x32xf32, #tpu.memory_space<vmem>>, vector<2x32xf32>
    tpu.vector_store %arg7[%c0_38, %c0_39], %159 {strides = array<i32>} : memref<2x32xf32, #tpu.memory_space<vmem>>, vector<2x32xf32>,
    return
  }
}

</mosaic_0001>

<bundles_post_ra>
// kernel: lstm_forward.1
= control target key start
LH: loop header
LB: loop body
LE: loop exit
PB: predicated region body
PF: predicated region fallthrough
CT: control target
= control target key end

     0   :  { %13 = vsyncpa [#allocation3], 0  ;;  %s1651_s0 = inlined_call_operand.hbm [shape: f32[16,16], index: 0, kind: input, shape index: {}]   ;;  %s1652_s1 = inlined_call_operand.hbm [shape: f32[16,128], index: 1, kind: input, shape index: {}]   ;;  %s1653_s2 = inlined_call_operand.hbm [shape: f32[32,128], index: 2, kind: input, shape index: {}]   ;;  %s1654_s3 = inlined_call_operand.vmem [shape: f32[1,128], index: 3, kind: input, shape index: {}]   ;;  %s1655_s4 = inlined_call_operand.vmem [shape: f32[1,2,32], index: 4, kind: input, shape index: {}]   ;;  %s1656_s5 = inlined_call_operand.vmem [shape: f32[1,2,32], index: 5, kind: input, shape index: {}]   ;;  %s1657_s6 = inlined_call_operand.vmem [shape: f32[16,32], index: 6, kind: output, shape index: {0}]   ;;  %s1658_s7 = inlined_call_operand.hbm [shape: f32[2,32], index: 7, kind: output, shape index: {1}]  }
   0x1   :  { %14 = vsyncpa [#allocation6], 0 }
   0x2   :  { %15 = vsyncpa [#allocation4], 0  ;;  %s1390_s24 = smov [#allocation5]   ;;  %s1391_s26 = smov [#allocation2]  }
   0x3   :  { %s33_s25 = sshll.u32 %s1390_s24, 4  ;;  %s21_s27 = sshll.u32 %s1391_s26, 4  ;;  %s34_s25 = int_to_ptr.vmem [resolvable:$true] %s33_s25  ;;  %s22_s27 = int_to_ptr.vmem [resolvable:$true] %s21_s27 }
   0x4   :  { %s1312_s28 = scalar_lea.vmem %s34_s25, 256  ;;  %p1317_p1 = scmp.lt.s32.totalorder %s34_s25, %s34_s25 }
   0x5   :  { %p1313_p0 = scmp.ne.s32.totalorder %s34_s25, %s1312_s28  ;;  %p1318_p2 = scmp.lt.s32.totalorder %s1312_s28, %s1312_s28 }
   0x7   :  { %p1319_p3 = por %p1318_p2, %p1317_p1 }
   0x9   :  { %p1320_p4 = pnand %p1319_p3, %p1313_p0 }
   0xb   :  { %1323 = shalt.err (!%p1320_p4)
}
   0xc   :  { %s1392_s29 = smov 128   ;;  %s1393_s30 = smov 8  }
   0xd   :  { %39 = dma.hbm_to_vmem [thread:$0]  %s1652_s1, 256, %s34_s25, [#allocation6], %s1392_s29, %s1392_s29, %s1393_s30  }
   0xe   :  { %s1332_s10 = scalar_lea.vmem %s22_s27, 256  ;;  %p1337_p6 = scmp.lt.s32.totalorder %s22_s27, %s22_s27 }
   0xf   :  { %p1333_p5 = scmp.ne.s32.totalorder %s22_s27, %s1332_s10  ;;  %p1338_p7 = scmp.lt.s32.totalorder %s1332_s10, %s1332_s10 }
  0x11   :  { %p1339_p8 = por %p1338_p7, %p1337_p6 }
  0x13   :  { %p1340_p9 = pnand %p1339_p8, %p1333_p5 }
  0x15   :  { %1343 = shalt.err (!%p1340_p9)
}
  0x16   :  { %27 = dma.hbm_to_vmem [thread:$0]  %s1651_s0, 256, %s22_s27, [#allocation3], %s1392_s29, %s1392_s29, %s1393_s30  }
  0x17   :  { %s1394_s13 = smov [#allocation7]  }
  0x18   :  { %s45_s14 = sshll.u32 %s1394_s13, 4  ;;  %s46_s14 = int_to_ptr.vmem [resolvable:$true] %s45_s14 }
  0x19   :  { %s1352_s15 = scalar_lea.vmem %s46_s14, 512  ;;  %p1357_p11 = scmp.lt.s32.totalorder %s46_s14, %s46_s14 }
  0x1a   :  { %p1353_p10 = scmp.ne.s32.totalorder %s46_s14, %s1352_s15  ;;  %p1358_p12 = scmp.lt.s32.totalorder %s1352_s15, %s1352_s15 }
  0x1c   :  { %p1359_p13 = por %p1358_p12, %p1357_p11 }
  0x1e   :  { %p1360_p0 = pnand %p1359_p13, %p1353_p10 }
  0x20   :  { %1363 = shalt.err (!%p1360_p0)
}
  0x21   :  { %51 = dma.hbm_to_vmem [thread:$0]  %s1653_s2, 512, %s46_s14, [#allocation6], %s1392_s29, %s1392_s29, %s1393_s30  }
  0x22   :  { %1384 = dma.done.wait [#allocation3], 256  }
  0x23   :  { %1385 = vsyncadd [#allocation3], 4294967040 }
  0x24   :  { %1386 = dma.done.wait [#allocation6], 768  }
  0x25   :  { %1387 = vsyncadd [#allocation6], 4294966528  ;;  %v1395_v0 = vmov 0.0   ;;  %vm1396_vm0 = vmmov 0   ;;  %v70_v1 = vld [vmem:[#allocation5 + $0x8] sm:$0xff]  ;;  %v69_v3 = vld [vmem:[#allocation5] sm:$0xff] }
  0x26   :  { %1141 = vmatprep.subr.mxu1 %v1395_v0  ;;  %1149 = vmatprep.mubr.msk.f32.mxu1 %vm1396_vm0, %v1395_v0  ;;  %v1453_v2 = vld [vmem:[#allocation7 + $0x18] sm:$0xff]  ;;  %v1456_v4 = vld [vmem:[#allocation7 + $0x10] sm:$0xff]  ;;  %v67_v5 = vld [vmem:[#allocation2] sm:$0xff]  ;;  %vm78_vm1 = vcmask 130048   ;;  %vm166_vm2 = vcmask 261120   ;;  %s1397_s18 = smov 64  }
  0x27   :  { %1134 = vmatprep.subr.mxu0 %v70_v1  ;;  %1142 = vmatpush3.msra.mxu1 %v1453_v2  ;;  %v68_v6 = vld [vmem:[#allocation2 + $0x8] sm:$0xff]  ;;  %v1463_v8 = vld [vmem:[#allocation7] sm:$0xff]  ;;  %vm273_vm3 = vcmask 254976   ;;  %s1399_s24 = smov 96   ;;  %vm606_vm4 = vcmask 261126   ;;  %vm494_vm5 = vcmask 259076  }
  0x28   :  { %1135 = vmatpush3.msra.mxu0 %v70_v1  ;;  %1143 = vmatprep.subr.mxu1 %v1395_v0  ;;  %v1460_v7 = vld [vmem:[#allocation7 + $0x8] sm:$0xff]  ;;  %v164_v9 = vld [vmem:[%s1655_s4] sm:$0x3]  ;;  %s1400_s25 = smov [#allocation8]  }
  0x29   :  { %1136 = vmatprep.subr.mxu0 %v69_v3  ;;  %1144 = vmatpush3.msra.mxu1 %v1456_v4  ;;  %v1071_v10 = vld [vmem:[%s1654_s3] ss:$0 sm:$0xff]  ;;  %s1398_s3 = smov 32   ;;  %s1059_s26 = sshll.u32 %s1400_s25, 4  ;;  %s1060_s26 = int_to_ptr.vmem [resolvable:$true] %s1059_s26 }
  0x2a   :  { %1137 = vmatpush3.msra.mxu0 %v69_v3  ;;  %1138 = vmatprep.mubr.msk.f32.mxu0 %vm78_vm1, %v67_v5  ;;  %v165_v19 = vld [vmem:[%s1656_s5] sm:$0x3]  ;;  %s1364_s29 = scalar_lea.vmem %s1060_s26, 32  ;;  %p1369_p2 = scmp.lt.s32.totalorder %s1060_s26, %s1060_s26 }
  0x2b   :  { %1145 = vmatprep.subr.mxu1 %v1395_v0  ;;  %1139 = vmatmul.mubr.msk.f32.vlgmr.msra.gmra.mxu0 %vm78_vm1, %v68_v6  ;;  %p1365_p1 = scmp.ne.s32.totalorder %s1060_s26, %s1364_s29  ;;  %p1370_p3 = scmp.lt.s32.totalorder %s1364_s29, %s1364_s29 }
  0x2c   :  { %1146 = vmatpush3.msra.mxu1 %v1460_v7  ;;  %1152 = vmatprep.subr.mxu0 %v1395_v0 }
  0x2d   :  { %1147 = vmatprep.subr.mxu1 %v1395_v0  ;;  %1153 = vmatpush3.msra.mxu0 %v1453_v2  ;;  %p1371_p4 = por %p1370_p3, %p1369_p2 }
  0x2e   :  { %1148 = vmatpush3.msra.mxu1 %v1463_v8  ;;  %1154 = vmatprep.subr.mxu0 %v1395_v0 }
  0x2f   :  { %1150 = vmatmul.mubr.msk.f32.vlgmr.msra.gmra.mxu1 %vm166_vm2, %v164_v9  ;;  %1155 = vmatpush3.msra.mxu0 %v1456_v4  ;;  %p1372_p5 = pnand %p1371_p4, %p1365_p1 }
  0x30   :  { %1156 = vmatprep.subr.mxu0 %v1395_v0  ;;  %1160 = vmatprep.mubr.msk.f32.mxu0 %vm1396_vm0, %v1395_v0 }
  0x31   :  { %1157 = vmatpush3.msra.mxu0 %v1460_v7  ;;  %1163 = vmatprep.subr.mxu1 %v1395_v0 }
  0x32   :  { %1158 = vmatprep.subr.mxu0 %v1395_v0  ;;  %1164 = vmatpush3.msra.mxu1 %v1453_v2 }
  0x33   :  { %1159 = vmatpush3.msra.mxu0 %v1463_v8  ;;  %1165 = vmatprep.subr.mxu1 %v1395_v0 }
  0x34   :  { %1166 = vmatpush3.msra.mxu1 %v1456_v4  ;;  %1171 = vmatprep.mubr.msk.f32.mxu1 %vm1396_vm0, %v1395_v0 }
  0x35   :  { %1167 = vmatprep.subr.mxu1 %v1395_v0  ;;  %1174 = vmatprep.subr.mxu0 %v1395_v0 }
  0x36   :  { %1168 = vmatpush3.msra.mxu1 %v1460_v7 }
  0x37   :  { %1169 = vmatprep.subr.mxu1 %v1395_v0 }
  0x38   :  { %1170 = vmatpush3.msra.mxu1 %v1463_v8 }
  0x39   :  { %1185 = vmatprep.subr.mxu1 %v1395_v0 }
  0xeb   :  { %v1140_v11 = vpop.f32.mrf.mxu0 }
  0xec   :  { %v1497_v12 = vadd.f32 %v1140_v11, %v1071_v10 }
  0xed   :  { %v151_v13 = vpop.f32.mrf.mxu0 }
  0xee   :  { %v1499_v14 = vadd.f32 %v1071_v10, %v151_v13 }
  0xef   :  { %v236_v15 = vpop.f32.mrf.mxu1 }
  0xf0   :  { %v240_v16 = vadd.f32 %v236_v15, %v1499_v14 }
  0xf1   :  { %v1151_v17 = vpop.f32.mrf.mxu1 }
  0xf2   :  { %1240 = vtanh.f32 %v240_v16  ;;  %v1075_v20 = vmul.f32 -1.442695, %v240_v16 }
  0xf4   :  { %1242 = vpow2.f32 %v1075_v20 }
  0xff   :  { %v1241_v18 = vpop.eup %1240 }
 0x100   :  { %254 = vrot.lane.b32.xlu0 %v1241_v18, %s1397_s18 }
 0x101   :  { %v1243_v21 = vpop.eup %1242 }
 0x102   :  { %v244_v22 = vadd.f32 1.0, %v1243_v21 }
 0x104   :  { %249 = vrot.lane.b32.xlu0 %v165_v19, %s1398_s3  ;;  %1244 = vrcp.f32 %v244_v22 }
 0x111   :  { %v1245_v23 = vpop.eup %1244 }
 0x172   :  { %v255_v24 = vpop.permute.xlu0 %254 }
 0x173   :  { %v257_v25 = vmul.f32 %v1245_v23, %v255_v24 }
 0x175   :  { %259 = vrot.lane.b32.xlu1 %v257_v25, %s1398_s3 }
 0x176   :  { %v250_v26 = vpop.permute.xlu0 %249 }
 0x177   :  { %v252_v27 = vmul.f32 %v1245_v23, %v250_v26 }
 0x1e7   :  { %v260_v28 = vpop.permute.xlu1 %259 }
 0x1e8   :  { %v262_v29 = vadd.f32 %v260_v28, %v252_v27 }
 0x1ea   :  { %1246 = vtanh.f32 %v262_v29  ;;  %v359_v45 = vrot.slane %v262_v29, 6 }
 0x1f7   :  { %v1247_v30 = vpop.eup %1246 }
 0x1f8   :  { %265 = vrot.lane.b32.xlu1 %v1247_v30, %s1397_s18 }
 0x26a   :  { %v266_v31 = vpop.permute.xlu1 %265 }
 0x26b   :  { %v268_v32 = vmul.f32 %v1245_v23, %v266_v31 }
 0x26d   :  { %270 = vrot.lane.b32.xlu0 %v268_v32, %s1398_s3 }
 0x2df   :  { %v271_v33 = vpop.permute.xlu0 %270 }
 0x2e0   :  { %274 = vst.msk [vmem:[%s1657_s6] sm:$0x3] %vm273_vm3, %v271_v33  ;;  %1161 = vmatmul.mubr.msk.f32.vlgmr.msra.gmra.mxu0 %vm166_vm2, %v271_v33 }
 0x2e1   :  { %1175 = vmatpush3.msra.mxu0 %v1453_v2  ;;  %1182 = vmatprep.mubr.msk.f32.mxu0 %vm1396_vm0, %v1395_v0 }
 0x2e2   :  { %1176 = vmatprep.subr.mxu0 %v1395_v0 }
 0x2e3   :  { %1177 = vmatpush3.msra.mxu0 %v1456_v4 }
 0x2e4   :  { %1178 = vmatprep.subr.mxu0 %v1395_v0 }
 0x2e5   :  { %1179 = vmatpush3.msra.mxu0 %v1460_v7 }
 0x2e6   :  { %1180 = vmatprep.subr.mxu0 %v1395_v0 }
 0x2e7   :  { %1181 = vmatpush3.msra.mxu0 %v1463_v8 }
 0x2e8   :  { %1196 = vmatprep.subr.mxu0 %v1395_v0 }
 0x3a0   :  { %v343_v34 = vpop.f32.mrf.mxu0 }
 0x3a1   :  { %v348_v35 = vrot.slane %v343_v34, 6 }
 0x3a2   :  { %v1162_v36 = vpop.f32.mrf.mxu0 }
 0x3a3   :  { %v350_v37 = vadd.f32 %v348_v35, %v1499_v14 }
 0x3a5   :  { %1248 = vtanh.f32 %v350_v37  ;;  %v1077_v39 = vmul.f32 -1.442695, %v350_v37 }
 0x3a7   :  { %1250 = vpow2.f32 %v1077_v39 }
 0x3b2   :  { %v1249_v38 = vpop.eup %1248 }
 0x3b3   :  { %363 = vrot.lane.b32.xlu1 %v1249_v38, %s1397_s18 }
 0x3b4   :  { %v1251_v40 = vpop.eup %1250 }
 0x3b5   :  { %v354_v41 = vadd.f32 1.0, %v1251_v40 }
 0x3b7   :  { %1252 = vrcp.f32 %v354_v41 }
 0x3c4   :  { %v1253_v42 = vpop.eup %1252 }
 0x3c5   :  { %v361_v46 = vmul.f32 %v1253_v42, %v359_v45 }
 0x425   :  { %v364_v43 = vpop.permute.xlu1 %363 }
 0x426   :  { %v366_v44 = vmul.f32 %v1253_v42, %v364_v43 }
 0x428   :  { %368 = vrot.lane.b32.xlu0 %v366_v44, %s1398_s3 }
 0x49a   :  { %v369_v47 = vpop.permute.xlu0 %368 }
 0x49b   :  { %v371_v48 = vadd.f32 %v369_v47, %v361_v46 }
 0x49d   :  { %1254 = vtanh.f32 %v371_v48  ;;  %v471_v3 = vrot.slane %v371_v48, 6 }
 0x4aa   :  { %v1255_v49 = vpop.eup %1254 }
 0x4ab   :  { %374 = vrot.lane.b32.xlu1 %v1255_v49, %s1397_s18 }
 0x51d   :  { %v375_v50 = vpop.permute.xlu1 %374 }
 0x51e   :  { %v1529_v51 = vmul.f32 %v1253_v42, %v375_v50 }
 0x520   :  { %v384_v52 = vrot.slane %v1529_v51, 2 }
 0x522   :  { %385 = vrot.lane.b32.xlu0 %v384_v52, %s1398_s3 }
 0x594   :  { %v386_v53 = vpop.permute.xlu0 %385 }
 0x595   :  { %1172 = vmatmul.mubr.msk.f32.vlgmr.msra.gmra.mxu1 %vm166_vm2, %v386_v53 }
 0x596   :  { %1186 = vmatpush3.msra.mxu1 %v1453_v2  ;;  %1193 = vmatprep.mubr.msk.f32.mxu1 %vm1396_vm0, %v1395_v0 }
 0x597   :  { %1187 = vmatprep.subr.mxu1 %v1395_v0 }
 0x598   :  { %1188 = vmatpush3.msra.mxu1 %v1456_v4 }
 0x599   :  { %1189 = vmatprep.subr.mxu1 %v1395_v0 }
 0x59a   :  { %1190 = vmatpush3.msra.mxu1 %v1460_v7 }
 0x59b   :  { %1191 = vmatprep.subr.mxu1 %v1395_v0 }
 0x59c   :  { %1192 = vmatpush3.msra.mxu1 %v1463_v8 }
 0x59d   :  { %1207 = vmatprep.subr.mxu1 %v1395_v0 }
 0x655   :  { %v455_v54 = vpop.f32.mrf.mxu1 }
 0x656   :  { %v460_v55 = vrot.slane %v455_v54, 4 }
 0x657   :  { %v1173_v56 = vpop.f32.mrf.mxu1 }
 0x658   :  { %v462_v57 = vadd.f32 %v460_v55, %v1499_v14 }
 0x65a   :  { %1256 = vtanh.f32 %v462_v57  ;;  %v1079_v59 = vmul.f32 -1.442695, %v462_v57 }
 0x65c   :  { %1258 = vpow2.f32 %v1079_v59 }
 0x667   :  { %v1257_v58 = vpop.eup %1256 }
 0x668   :  { %475 = vrot.lane.b32.xlu1 %v1257_v58, %s1397_s18 }
 0x669   :  { %v1259_v60 = vpop.eup %1258 }
 0x66a   :  { %v466_v61 = vadd.f32 1.0, %v1259_v60 }
 0x66c   :  { %1260 = vrcp.f32 %v466_v61 }
 0x679   :  { %v1261_v62 = vpop.eup %1260 }
 0x67a   :  { %v473_v5 = vmul.f32 %v1261_v62, %v471_v3 }
 0x6da   :  { %v476_v63 = vpop.permute.xlu1 %475 }
 0x6db   :  { %v478_v1 = vmul.f32 %v1261_v62, %v476_v63 }
 0x6dd   :  { %480 = vrot.lane.b32.xlu0 %v478_v1, %s1398_s3 }
 0x74f   :  { %v481_v6 = vpop.permute.xlu0 %480 }
 0x750   :  { %v483_v9 = vadd.f32 %v481_v6, %v473_v5 }
 0x752   :  { %1262 = vtanh.f32 %v483_v9  ;;  %v583_v28 = vrot.slane %v483_v9, 6 }
 0x75f   :  { %v1263_v10 = vpop.eup %1262 }
 0x760   :  { %486 = vrot.lane.b32.xlu1 %v1263_v10, %s1397_s18 }
 0x7d2   :  { %v487_v11 = vpop.permute.xlu1 %486 }
 0x7d3   :  { %v1548_v13 = vmul.f32 %v1261_v62, %v487_v11 }
 0x7d5   :  { %v496_v15 = vrot.slane %v1548_v13, 4 }
 0x7d7   :  { %497 = vrot.lane.b32.xlu0 %v496_v15, %s1398_s3 }
 0x849   :  { %v498_v16 = vpop.permute.xlu0 %497 }
 0x84a   :  { %1183 = vmatmul.mubr.msk.f32.vlgmr.msra.gmra.mxu0 %vm166_vm2, %v498_v16 }
 0x84b   :  { %1197 = vmatpush3.msra.mxu0 %v1453_v2  ;;  %1204 = vmatprep.mubr.msk.f32.mxu0 %vm1396_vm0, %v1395_v0 }
 0x84c   :  { %1198 = vmatprep.subr.mxu0 %v1395_v0 }
 0x84d   :  { %1199 = vmatpush3.msra.mxu0 %v1456_v4 }
 0x84e   :  { %1200 = vmatprep.subr.mxu0 %v1395_v0 }
 0x84f   :  { %1201 = vmatpush3.msra.mxu0 %v1460_v7 }
 0x850   :  { %1202 = vmatprep.subr.mxu0 %v1395_v0 }
 0x851   :  { %1203 = vmatpush3.msra.mxu0 %v1463_v8 }
 0x852   :  { %1218 = vmatprep.subr.mxu0 %v1395_v0 }
 0x90a   :  { %v567_v17 = vpop.f32.mrf.mxu0 }
 0x90b   :  { %v572_v18 = vrot.slane %v567_v17, 2 }
 0x90c   :  { %v1184_v19 = vpop.f32.mrf.mxu0 }
 0x90d   :  { %v574_v20 = vadd.f32 %v572_v18, %v1499_v14 }
 0x90f   :  { %1264 = vtanh.f32 %v574_v20  ;;  %v1081_v22 = vmul.f32 -1.442695, %v574_v20 }
 0x911   :  { %1266 = vpow2.f32 %v1081_v22 }
 0x91c   :  { %v1265_v21 = vpop.eup %1264 }
 0x91d   :  { %587 = vrot.lane.b32.xlu1 %v1265_v21, %s1397_s18 }
 0x91e   :  { %v1267_v23 = vpop.eup %1266 }
 0x91f   :  { %v578_v24 = vadd.f32 1.0, %v1267_v23 }
 0x921   :  { %1268 = vrcp.f32 %v578_v24 }
 0x92e   :  { %v1269_v25 = vpop.eup %1268 }
 0x92f   :  { %v585_v29 = vmul.f32 %v1269_v25, %v583_v28 }
 0x98f   :  { %v588_v26 = vpop.permute.xlu1 %587 }
 0x990   :  { %v590_v27 = vmul.f32 %v1269_v25, %v588_v26 }
 0x992   :  { %592 = vrot.lane.b32.xlu0 %v590_v27, %s1398_s3 }
 0xa04   :  { %v593_v30 = vpop.permute.xlu0 %592 }
 0xa05   :  { %v595_v31 = vadd.f32 %v593_v30, %v585_v29 }
 0xa07   :  { %1270 = vtanh.f32 %v595_v31  ;;  %v692_v46 = vrot.slane %v595_v31, 6 }
 0xa14   :  { %v1271_v14 = vpop.eup %1270 }
 0xa15   :  { %598 = vrot.lane.b32.xlu1 %v1271_v14, %s1397_s18 }
 0xa87   :  { %v599_v32 = vpop.permute.xlu1 %598 }
 0xa88   :  { %v1567_v33 = vmul.f32 %v1269_v25, %v599_v32 }
 0xa8a   :  { %v608_v34 = vrot.slane %v1567_v33, 6 }
 0xa8c   :  { %609 = vrot.lane.b32.xlu0 %v608_v34, %s1398_s3 }
 0xafe   :  { %v610_v35 = vpop.permute.xlu0 %609 }
 0xaff   :  { %1194 = vmatmul.mubr.msk.f32.vlgmr.msra.gmra.mxu1 %vm166_vm2, %v610_v35 }
 0xb00   :  { %1208 = vmatpush3.msra.mxu1 %v1453_v2  ;;  %1215 = vmatprep.mubr.msk.f32.mxu1 %vm1396_vm0, %v1395_v0 }
 0xb01   :  { %1209 = vmatprep.subr.mxu1 %v1395_v0 }
 0xb02   :  { %1210 = vmatpush3.msra.mxu1 %v1456_v4 }
 0xb03   :  { %1211 = vmatprep.subr.mxu1 %v1395_v0 }
 0xb04   :  { %1212 = vmatpush3.msra.mxu1 %v1460_v7 }
 0xb05   :  { %1213 = vmatprep.subr.mxu1 %v1395_v0 }
 0xb06   :  { %1214 = vmatpush3.msra.mxu1 %v1463_v8 }
 0xbbf   :  { %v679_v36 = vpop.f32.mrf.mxu1 }
 0xbc0   :  { %v683_v37 = vadd.f32 %v679_v36, %v1497_v12 }
 0xbc1   :  { %v1195_v38 = vpop.f32.mrf.mxu1 }
 0xbc2   :  { %1272 = vtanh.f32 %v683_v37  ;;  %v1083_v40 = vmul.f32 -1.442695, %v683_v37 }
 0xbc4   :  { %1274 = vpow2.f32 %v1083_v40 }
 0xbcf   :  { %v1273_v39 = vpop.eup %1272 }
 0xbd0   :  { %696 = vrot.lane.b32.xlu1 %v1273_v39, %s1397_s18 }
 0xbd1   :  { %v1275_v41 = vpop.eup %1274 }
 0xbd2   :  { %v687_v42 = vadd.f32 1.0, %v1275_v41 }
 0xbd4   :  { %1276 = vrcp.f32 %v687_v42 }
 0xbe1   :  { %v1277_v43 = vpop.eup %1276 }
 0xbe2   :  { %v694_v47 = vmul.f32 %v1277_v43, %v692_v46 }
 0xc42   :  { %v697_v44 = vpop.permute.xlu1 %696 }
 0xc43   :  { %v699_v45 = vmul.f32 %v1277_v43, %v697_v44 }
 0xc45   :  { %701 = vrot.lane.b32.xlu0 %v699_v45, %s1398_s3 }
 0xcb7   :  { %v702_v48 = vpop.permute.xlu0 %701 }
 0xcb8   :  { %v704_v49 = vadd.f32 %v702_v48, %v694_v47 }
 0xcba   :  { %1278 = vtanh.f32 %v704_v49 }
 0xcc7   :  { %v1279_v50 = vpop.eup %1278 }
 0xcc8   :  { %707 = vrot.lane.b32.xlu1 %v1279_v50, %s1397_s18 }
 0xd3a   :  { %v708_v52 = vpop.permute.xlu1 %707 }
 0xd3b   :  { %v710_v53 = vmul.f32 %v1277_v43, %v708_v52 }
 0xd3d   :  { %712 = vrot.lane.b32.xlu0 %v710_v53, %s1398_s3 }
 0xdaf   :  { %v713_v54 = vpop.permute.xlu0 %712 }
 0xdb0   :  { %715 = vst.msk [vmem:[%s1657_s6 + $0x8] sm:$0x3] %vm273_vm3, %v713_v54  ;;  %1205 = vmatmul.mubr.msk.f32.vlgmr.msra.gmra.mxu0 %vm166_vm2, %v713_v54 }
 0xdb1   :  { %1219 = vmatpush3.msra.mxu0 %v1453_v2  ;;  %1226 = vmatprep.mubr.msk.f32.mxu0 %vm1396_vm0, %v1395_v0 }
 0xdb2   :  { %1220 = vmatprep.subr.mxu0 %v1395_v0 }
 0xdb3   :  { %1221 = vmatpush3.msra.mxu0 %v1456_v4 }
 0xdb4   :  { %1222 = vmatprep.subr.mxu0 %v1395_v0 }
 0xdb5   :  { %1223 = vmatpush3.msra.mxu0 %v1460_v7 }
 0xdb6   :  { %1224 = vmatprep.subr.mxu0 %v1395_v0  ;;  %v800_v0 = vrot.slane %v704_v49, 6 }
 0xdb7   :  { %1225 = vmatpush3.msra.mxu0 %v1463_v8 }
 0xe70   :  { %v784_v55 = vpop.f32.mrf.mxu0 }
 0xe71   :  { %v789_v56 = vrot.slane %v784_v55, 6 }
 0xe72   :  { %v1206_v57 = vpop.f32.mrf.mxu0 }
 0xe73   :  { %v791_v2 = vadd.f32 %v789_v56, %v1497_v12 }
 0xe75   :  { %1280 = vtanh.f32 %v791_v2  ;;  %v1085_v59 = vmul.f32 -1.442695, %v791_v2 }
 0xe77   :  { %1282 = vpow2.f32 %v1085_v59 }
 0xe82   :  { %v1281_v58 = vpop.eup %1280 }
 0xe83   :  { %804 = vrot.lane.b32.xlu1 %v1281_v58, %s1397_s18 }
 0xe84   :  { %v1283_v4 = vpop.eup %1282 }
 0xe85   :  { %v795_v60 = vadd.f32 1.0, %v1283_v4 }
 0xe87   :  { %1284 = vrcp.f32 %v795_v60 }
 0xe94   :  { %v1285_v61 = vpop.eup %1284 }
 0xe95   :  { %v802_v8 = vmul.f32 %v1285_v61, %v800_v0 }
 0xef5   :  { %v805_v7 = vpop.permute.xlu1 %804 }
 0xef6   :  { %v807_v62 = vmul.f32 %v1285_v61, %v805_v7 }
 0xef8   :  { %809 = vrot.lane.b32.xlu0 %v807_v62, %s1398_s3 }
 0xf6a   :  { %v810_v63 = vpop.permute.xlu0 %809 }
 0xf6b   :  { %v812_v1 = vadd.f32 %v810_v63, %v802_v8 }
 0xf6d   :  { %1286 = vtanh.f32 %v812_v1  ;;  %v911_v25 = vrot.slane %v812_v1, 6 }
 0xf7a   :  { %v1287_v3 = vpop.eup %1286 }
 0xf7b   :  { %815 = vrot.lane.b32.xlu1 %v1287_v3, %s1397_s18 }
 0xfed   :  { %v816_v5 = vpop.permute.xlu1 %815 }
 0xfee   :  { %v818_v6 = vmul.f32 %v1285_v61, %v816_v5 }
 0xff0   :  { %v824_v9 = vrot.slane %v818_v6, 2 }
 0xff2   :  { %825 = vrot.lane.b32.xlu0 %v824_v9, %s1398_s3 }
0x1064   :  { %v826_v10 = vpop.permute.xlu0 %825 }
0x1065   :  { %1216 = vmatmul.mubr.msk.f32.vlgmr.msra.gmra.mxu1 %vm166_vm2, %v826_v10 }
0x1125   :  { %v895_v11 = vpop.f32.mrf.mxu1 }
0x1126   :  { %v900_v15 = vrot.slane %v895_v11, 4 }
0x1127   :  { %v1217_v16 = vpop.f32.mrf.mxu1 }
0x1128   :  { %v902_v17 = vadd.f32 %v900_v15, %v1497_v12 }
0x112a   :  { %1288 = vtanh.f32 %v902_v17  ;;  %v1087_v19 = vmul.f32 -1.442695, %v902_v17 }
0x112c   :  { %1290 = vpow2.f32 %v1087_v19 }
0x1137   :  { %v1289_v18 = vpop.eup %1288 }
0x1138   :  { %915 = vrot.lane.b32.xlu1 %v1289_v18, %s1397_s18 }
0x1139   :  { %v1291_v20 = vpop.eup %1290 }
0x113a   :  { %v906_v21 = vadd.f32 1.0, %v1291_v20 }
0x113c   :  { %1292 = vrcp.f32 %v906_v21 }
0x1149   :  { %v1293_v22 = vpop.eup %1292 }
0x114a   :  { %v913_v26 = vmul.f32 %v1293_v22, %v911_v25 }
0x11aa   :  { %v916_v23 = vpop.permute.xlu1 %915 }
0x11ab   :  { %v918_v24 = vmul.f32 %v1293_v22, %v916_v23 }
0x11ad   :  { %920 = vrot.lane.b32.xlu0 %v918_v24, %s1398_s3 }
0x121f   :  { %v921_v27 = vpop.permute.xlu0 %920 }
0x1220   :  { %v923_v28 = vadd.f32 %v921_v27, %v913_v26 }
0x1222   :  { %1294 = vtanh.f32 %v923_v28  ;;  %v1022_v45 = vrot.slane %v923_v28, 6 }
0x122f   :  { %v1295_v29 = vpop.eup %1294 }
0x1230   :  { %926 = vrot.lane.b32.xlu1 %v1295_v29, %s1397_s18 }
0x12a2   :  { %v927_v30 = vpop.permute.xlu1 %926 }
0x12a3   :  { %v929_v31 = vmul.f32 %v1293_v22, %v927_v30 }
0x12a5   :  { %v935_v14 = vrot.slane %v929_v31, 4 }
0x12a7   :  { %936 = vrot.lane.b32.xlu0 %v935_v14, %s1398_s3 }
0x1319   :  { %v937_v32 = vpop.permute.xlu0 %936 }
0x131a   :  { %1227 = vmatmul.mubr.msk.f32.vlgmr.msra.gmra.mxu0 %vm166_vm2, %v937_v32 }
0x13da   :  { %v1006_v34 = vpop.f32.mrf.mxu0 }
0x13db   :  { %v1011_v35 = vrot.slane %v1006_v34, 2 }
0x13dc   :  { %v1228_v36 = vpop.f32.mrf.mxu0 }
0x13dd   :  { %v1013_v37 = vadd.f32 %v1011_v35, %v1497_v12 }
0x13df   :  { %1296 = vtanh.f32 %v1013_v37  ;;  %v1089_v39 = vmul.f32 -1.442695, %v1013_v37 }
0x13e1   :  { %1298 = vpow2.f32 %v1089_v39 }
0x13ec   :  { %v1297_v38 = vpop.eup %1296 }
0x13ed   :  { %1026 = vrot.lane.b32.xlu1 %v1297_v38, %s1397_s18 }
0x13ee   :  { %v1299_v40 = vpop.eup %1298 }
0x13ef   :  { %v1017_v41 = vadd.f32 1.0, %v1299_v40 }
0x13f1   :  { %1300 = vrcp.f32 %v1017_v41 }
0x13fe   :  { %v1301_v42 = vpop.eup %1300 }
0x13ff   :  { %v1024_v46 = vmul.f32 %v1301_v42, %v1022_v45 }
0x145f   :  { %v1027_v43 = vpop.permute.xlu1 %1026 }
0x1460   :  { %v1029_v44 = vmul.f32 %v1301_v42, %v1027_v43 }
0x1462   :  { %1031 = vrot.lane.b32.xlu0 %v1029_v44, %s1398_s3 }
0x14d4   :  { %v1032_v47 = vpop.permute.xlu0 %1031 }
0x14d5   :  { %v1034_v48 = vadd.f32 %v1032_v47, %v1024_v46 }
0x14d7   :  { %1302 = vtanh.f32 %v1034_v48  ;;  %1047 = vrot.lane.b32.xlu0 %v1034_v48, %s1399_s24 }
0x14db   :  { %491 = vrot.lane.b32.xlu0 %v1548_v13, %s1398_s3 }
0x14df   :  { %820 = vrot.lane.b32.xlu0 %v818_v6, %s1398_s3 }
0x14e4   :  { %v1303_v12 = vpop.eup %1302 }
0x14e5   :  { %1037 = vrot.lane.b32.xlu1 %v1303_v12, %s1397_s18 }
0x14e9   :  { %379 = vrot.lane.b32.xlu1 %v1529_v51, %s1398_s3 }
0x14ed   :  { %603 = vrot.lane.b32.xlu1 %v1567_v33, %s1398_s3 }
0x14f1   :  { %931 = vrot.lane.b32.xlu1 %v929_v31, %s1398_s3 }
0x1549   :  { %v1048_v49 = vpop.permute.xlu0 %1047 }
0x154a   :  { %1050 = vst.msk [vmem:[#allocation8 - $0x6] sm:$0xc0] %vm606_vm4, %v1048_v49 }
0x154d   :  { %v492_v13 = vpop.permute.xlu0 %491 }
0x154e   :  { %495 = vst.msk [vmem:[%s1657_s6] sm:$0x30] %vm494_vm5, %v492_v13 }
0x154f   :  { %1375 = shalt.err (!%p1372_p5)
}
0x1550   :  { %1062 = dma.vmem_to_hbm [thread:$0]  %s1060_s26, 32, %s1658_s7, [#allocation4]   ;;  %vm382_vm6 = vcmask 257026  }
0x1551   :  { %v821_v51 = vpop.permute.xlu0 %820 }
0x1552   :  { %823 = vst.msk [vmem:[%s1657_s6 + $0x8] sm:$0xc] %vm382_vm6, %v821_v51 }
0x1557   :  { %v1038_v33 = vpop.permute.xlu1 %1037 }
0x1558   :  { %v1040_v50 = vmul.f32 %v1301_v42, %v1038_v33 }
0x155a   :  { %1042 = vrot.lane.b32.xlu0 %v1040_v50, %s1398_s3 }
0x155b   :  { %v380_v52 = vpop.permute.xlu1 %379 }
0x155c   :  { %383 = vst.msk [vmem:[%s1657_s6] sm:$0xc] %vm382_vm6, %v380_v52 }
0x155f   :  { %v604_v53 = vpop.permute.xlu1 %603 }
0x1560   :  { %607 = vst.msk [vmem:[%s1657_s6] sm:$0xc0] %vm606_vm4, %v604_v53 }
0x1563   :  { %v932_v54 = vpop.permute.xlu1 %931 }
0x1564   :  { %934 = vst.msk [vmem:[%s1657_s6 + $0x8] sm:$0x30] %vm494_vm5, %v932_v54 }
0x15cc   :  { %v1043_v55 = vpop.permute.xlu0 %1042 }
0x15cd   :  { %1045 = vst.msk [vmem:[%s1657_s6 + $0x8] sm:$0xc0] %vm606_vm4, %v1043_v55 }
0x15ce   :  { %1388 = dma.done.wait [#allocation4], 32  }
0x15cf   :  { %1389 = vsyncadd [#allocation4], 4294967264 }
0x15d0   :  { %1068 = vsyncpa [#allocation3], 1 }
0x15d1   :  { %1069 = vsyncpa [#allocation6], 1 }
0x15d2   :  { %1070 = vsyncpa [#allocation4], 1 }

</bundles_post_ra>
